<compile_context>
chip_gen: v7x
topology: tpu7x:2x2x1
jax: 0.10.0
libtpu: 0.0.40
codegen_flags: <defaults>
</compile_context>

<pallas_src>
import functools
import math

import jax
import jax.numpy as jnp
from jax.experimental import pallas as pl
from jax.experimental.pallas import tpu as pltpu

_INV_SQRT2 = 1.0 / math.sqrt(2.0)


def _round_up(x, m):
    return ((x + m - 1) // m) * m


def _vmem_block_bytes(shape, itemsize=4):
    """Estimate of a block's VMEM footprint incl. (8, 128) tiling padding."""
    if len(shape) == 1:
        return _round_up(shape[0], 128) * itemsize
    lead = 1
    for d in shape[:-2]:
        lead *= d
    return lead * _round_up(shape[-2], 8) * _round_up(shape[-1], 128) * itemsize


def _vmem_capacity_bytes():
    try:
        cap = getattr(pltpu.get_tpu_info(), "vmem_capacity_bytes", None)
        if cap:
            return int(cap)
    except Exception:
        pass
    return 64 * 1024 * 1024  # conservative default (v7x per-TensorCore)


# ------------------------------ kernels ----------------------------------- #
def _classifier_epilogue(pooled, w1_ref, b1_ref, w2_ref, b2_ref, out_ref):
    """pooled [tb, Hw] (1/S mean scale pre-folded into w1) -> Linear -> GELU -> Linear."""
    x = jnp.dot(pooled, w1_ref[...], preferred_element_type=jnp.float32)
    x = x + b1_ref[...]
    # nn.GELU() default = exact (erf-based) gelu
    x = 0.5 * x * (1.0 + jax.lax.erf(x * _INV_SQRT2))
    logits = jnp.dot(x, w2_ref[...], preferred_element_type=jnp.float32)
    logits = logits + b2_ref[...]
    out_ref[...] = logits.astype(out_ref.dtype)


def _bert_cls_fused_kernel(hidden_ref, w1_ref, b1_ref, w2_ref, b2_ref, out_ref):
    """grid = (batch_tiles,): one full-sequence block per step, no reduction axis."""
    # TODO(synk): dropout is identity in eval mode (p only applies in training).
    pooled = jnp.sum(hidden_ref[...], axis=1, dtype=jnp.float32)  # [tb, Hw]
    _classifier_epilogue(pooled, w1_ref, b1_ref, w2_ref, b2_ref, out_ref)


def _bert_cls_reduce_kernel(hidden_ref, w1_ref, b1_ref, w2_ref, b2_ref, out_ref,
                            acc_ref, *, seq_valid, ts):
    """grid = (batch_tiles, seq_tiles): streamed seq reduction into f32 scratch."""
    s_idx = pl.program_id(1)

    @pl.when(s_idx == 0)
    def _():
        acc_ref[...] = jnp.zeros_like(acc_ref)

    h = hidden_ref[...]  # [tb, ts, Hw], native dtype
    # Mask the ragged seq tail in-kernel (no wrapper-side jnp.pad HBM pass).
    pos = s_idx * ts + jax.lax.broadcasted_iota(jnp.int32, h.shape, 1)
    h = jnp.where(pos < seq_valid, h, jnp.zeros_like(h))
    # Accumulate in f32 without materializing an upcast copy of the tile.
    acc_ref[...] += jnp.sum(h, axis=1, dtype=jnp.float32)

    @pl.when(s_idx == pl.num_programs(1) - 1)
    def _():
        _classifier_epilogue(acc_ref[...], w1_ref, b1_ref, w2_ref, b2_ref, out_ref)


# ------------------------------ wrapper ------------------------------------ #
def bert_cls_head(last_hidden, w1, b1, w2, b2, *, force_seq_tile=None):
    """Dropout(eval) -> mean pool over seq -> Linear(H,H) -> GELU -> Linear(H,C).

    last_hidden: [B, S, H] (streamed in its native dtype, no extra HBM pass);
    w1: [H, H]; b1: [H]; w2: [H, C]; b2: [C]  (stored [in, out]; x @ W + b).
    """
    B, S, H = last_hidden.shape
    C = w2.shape[1]
    Cp = _round_up(C, 128)  # lane-dense logits -> unmasked stores
    itemsize = jnp.dtype(last_hidden.dtype).itemsize

    # ---- lane-pack narrow hidden: view [B, S, H] as [B, S/g, g*H] --------- #
    g = 1
    if H < 128 and 128 % H == 0 and S % (128 // H) == 0:
        g = 128 // H
    S_grid, H_w = S // g, H * g
    hid = last_hidden if g == 1 else last_hidden.reshape(B, S_grid, H_w)

    # ---- classifier params (tiny): fold lane-group sum + 1/S into w1 ------ #
    inv_s = 1.0 / S
    w1_eff = jnp.tile(w1.astype(jnp.float32), (g, 1)) * inv_s          # [Hw, H]
    b1_2d = b1.astype(jnp.float32).reshape(1, H)
    w2p = jnp.pad(w2.astype(jnp.float32), ((0, 0), (0, Cp - C)))       # [H, Cp]
    b2_2d = jnp.pad(b2.astype(jnp.float32), (0, Cp - C)).reshape(1, Cp)

    # ---- VMEM budget (per TensorCore; weights are ALSO double-buffered) --- #
    vmem_cap = _vmem_capacity_bytes()
    budget = int(0.70 * vmem_cap)
    weight_bytes = 2 * (_vmem_block_bytes((H_w, H)) + _vmem_block_bytes((1, H))
                        + _vmem_block_bytes((H, Cp)) + _vmem_block_bytes((1, Cp)))

    def fits(tb, ts, with_acc):
        streamed = 2 * _vmem_block_bytes((tb, ts, H_w), itemsize)
        out_b = 2 * _vmem_block_bytes((tb, Cp))
        acc_b = _vmem_block_bytes((tb, H_w)) if with_acc else 0
        return streamed + weight_bytes + out_b + acc_b <= budget

    def pick_tb(fit_fn):
        # batch tile: multiples of 8 (f32 sublane) up to round_up(B, 8); a
        # ragged last tile is fine (row-wise math, OOB stores are dropped).
        cands = [B] if B < 8 else list(range(8, _round_up(B, 8) + 1, 8))
        cands = sorted(set(cands), reverse=True)
        fitting = [t for t in cands if fit_fn(t)]
        if not fitting:
            return cands[-1]
        # prefer >= 2 batch tiles so v7x's second TensorCore gets a shard
        multi = [t for t in fitting if pl.cdiv(B, t) >= 2]
        return max(multi) if multi else max(fitting)

    def weight_specs(cmap):
        return [pl.BlockSpec((H_w, H), cmap), pl.BlockSpec((1, H), cmap),
                pl.BlockSpec((H, Cp), cmap), pl.BlockSpec((1, Cp), cmap)]

    cost = pl.CostEstimate(
        flops=B * S * H + 2 * B * H_w * H + 2 * B * H * Cp,
        transcendentals=B * H,
        bytes_accessed=B * S * H * itemsize
        + (H_w * H + H + H * Cp + Cp) * 4 + B * Cp * 4,
    )

    use_fused = force_seq_tile is None
    if use_fused:
        tb = pick_tb(lambda t: fits(t, S_grid, with_acc=False))
        use_fused = fits(tb, S_grid, with_acc=False)

    if use_fused:
        # -------- preferred path: full-seq block, fully parallel grid ------ #
        need = (2 * _vmem_block_bytes((tb, S_grid, H_w), itemsize)
                + weight_bytes + 2 * _vmem_block_bytes((tb, Cp)))
        out = pl.pallas_call(
            _bert_cls_fused_kernel,
            out_shape=jax.ShapeDtypeStruct((B, Cp), jnp.float32),
            grid=(pl.cdiv(B, tb),),
            in_specs=[pl.BlockSpec((tb, S_grid, H_w), lambda b: (b, 0, 0))]
            + weight_specs(lambda b: (0, 0)),
            out_specs=pl.BlockSpec((tb, Cp), lambda b: (b, 0)),
            compiler_params=pltpu.CompilerParams(
                dimension_semantics=("parallel",),
                vmem_limit_bytes=int(min(vmem_cap, max(need + (8 << 20), 32 << 20))),
            ),
            cost_estimate=cost,
        )(hid, w1_eff, b1_2d, w2p, b2_2d)
        return out[:B, :C]

    # -------- fallback: seq-tiled reduction (full-S block does not fit) ---- #
    tb = pick_tb(lambda t: fits(t, 8, with_acc=True))
    if force_seq_tile is not None:
        ts = int(force_seq_tile)
    else:
        ts = _round_up(S_grid, 8)
        while ts > 8 and not fits(tb, ts, with_acc=True):
            ts -= 8
    kernel = functools.partial(_bert_cls_reduce_kernel, seq_valid=S_grid, ts=ts)
    need = (2 * _vmem_block_bytes((tb, ts, H_w), itemsize) + weight_bytes
            + 2 * _vmem_block_bytes((tb, Cp)) + _vmem_block_bytes((tb, H_w)))
    out = pl.pallas_call(
        kernel,
        out_shape=jax.ShapeDtypeStruct((B, Cp), jnp.float32),
        grid=(pl.cdiv(B, tb), pl.cdiv(S_grid, ts)),
        in_specs=[pl.BlockSpec((tb, ts, H_w), lambda b, s: (b, s, 0))]
        + weight_specs(lambda b, s: (0, 0)),
        out_specs=pl.BlockSpec((tb, Cp), lambda b, s: (b, 0)),
        scratch_shapes=[pltpu.VMEM((tb, H_w), jnp.float32)],
        compiler_params=pltpu.CompilerParams(
            dimension_semantics=("parallel", "arbitrary"),
            vmem_limit_bytes=int(min(vmem_cap, max(need + (8 << 20), 32 << 20))),
        ),
        cost_estimate=cost,
    )(hid, w1_eff, b1_2d, w2p, b2_2d)
    return out[:B, :C]


# ------------------------- synthetic "Embedding" --------------------------- #
def synthetic_embedding(token_ids, word_emb, pos_emb, ln_gamma, ln_beta):
    """Minimal BERT-style embedding backbone producing last_hidden_state.

    Plain-JAX glue (gather + layernorm); the classification hot path lives in
    the Pallas kernels above.
    """
    x = word_emb[token_ids] + pos_emb[None, : token_ids.shape[1], :]
    mu = jnp.mean(x, axis=-1, keepdims=True)
    var = jnp.mean((x - mu) ** 2, axis=-1, keepdims=True)
    x = (x - mu) * jax.lax.rsqrt(var + 1e-12)
    return x * ln_gamma + ln_beta  # [B, S, H]


# --------------------------------- main ------------------------------------ #
if __name__ == "__main__":
    # Small config consistent with the module's forward.
    # seq not a multiple of 8 exercises the ragged-tile handling.
    B, S, H, C = 2, 40, 32, 4  # batch, seq, hidden (embedding_size), num_classes
    VOCAB = 64

    key = jax.random.PRNGKey(0)
    k_ids, k_we, k_pe, k_w1, k_b1, k_w2, k_b2 = jax.random.split(key, 7)

    # Deterministic synthetic parameters (shapes per module __init__).
    token_ids = jax.random.randint(k_ids, (B, S), 0, VOCAB)
    word_emb = jax.random.normal(k_we, (VOCAB, H), jnp.float32) * 0.02
    pos_emb = jax.random.normal(k_pe, (S, H), jnp.float32) * 0.02
    ln_gamma = jnp.ones((H,), jnp.float32)
    ln_beta = jnp.zeros((H,), jnp.float32)

    # classifier = Linear(H, H) -> GELU -> Linear(H, C); stored as [in, out].
    w1 = jax.random.normal(k_w1, (H, H), jnp.float32) * (1.0 / math.sqrt(H))
    b1 = jax.random.normal(k_b1, (H,), jnp.float32) * 0.01
    w2 = jax.random.normal(k_w2, (H, C), jnp.float32) * (1.0 / math.sqrt(H))
    b2 = jax.random.normal(k_b2, (C,), jnp.float32) * 0.01

    # Forward pass (jit so the free reshape / tiny weight prep fuse with the call).
    last_hidden = synthetic_embedding(token_ids, word_emb, pos_emb, ln_gamma, ln_beta)
    logits = jax.block_until_ready(jax.jit(bert_cls_head)(last_hidden, w1, b1, w2, b2))

    # Also exercise the seq-tiled reduction fallback (pl.when + iota mask) on
    # the same toy shapes.
    tiled_head = jax.jit(functools.partial(bert_cls_head, force_seq_tile=8))
    logits_tiled = jax.block_until_ready(tiled_head(last_hidden, w1, b1, w2, b2))

    # fp32 reference, matching the PyTorch module's eval-mode forward.
    pooled_ref = jnp.mean(last_hidden, axis=1)
    h_ref = pooled_ref @ w1 + b1
    h_ref = 0.5 * h_ref * (1.0 + jax.lax.erf(h_ref / math.sqrt(2.0)))
    logits_ref = h_ref @ w2 + b2

    assert logits.shape == (B, C)
    assert jnp.allclose(logits, logits_ref, atol=1e-4, rtol=1e-4), (
        jnp.max(jnp.abs(logits - logits_ref)))
    assert jnp.allclose(logits_tiled, logits_ref, atol=1e-4, rtol=1e-4), (
        jnp.max(jnp.abs(logits_tiled - logits_ref)))
    print("KERNEL_OK")
</pallas_src>

<mosaic_0001>
module attributes {stable_mosaic.version = 11 : i64} {
  func.func @_bert_cls_fused_kernel(%arg0: i32, %arg1: memref<2x10x128xf32, #tpu.memory_space<vmem>>, %arg2: memref<128x32xf32, #tpu.memory_space<vmem>>, %arg3: memref<1x32xf32, #tpu.memory_space<vmem>>, %arg4: memref<32x128xf32, #tpu.memory_space<vmem>>, %arg5: memref<1x128xf32, #tpu.memory_space<vmem>>, %arg6: memref<2x128xf32, #tpu.memory_space<vmem>>) attributes {dimension_semantics = [#tpu.dimension_semantics<parallel>], iteration_bounds = array<i64: 1>, scalar_prefetch = 0 : i64, scratch_operands = 0 : i64, tpu.core_type = #tpu.core_type<tc>, window_params = [{transform_indices = @transform_0, window_bounds = array<i64: 2, 10, 128>}, {pipeline_mode = #tpu.pipeline_mode<synchronous>, transform_indices = @transform_1, window_bounds = array<i64: 128, 32>}, {pipeline_mode = #tpu.pipeline_mode<synchronous>, transform_indices = @transform_2, window_bounds = array<i64: 1, 32>}, {pipeline_mode = #tpu.pipeline_mode<synchronous>, transform_indices = @transform_3, window_bounds = array<i64: 32, 128>}, {pipeline_mode = #tpu.pipeline_mode<synchronous>, transform_indices = @transform_4, window_bounds = array<i64: 1, 128>}, {transform_indices = @transform_5, window_bounds = array<i64: 2, 128>}]} {
    %c0 = arith.constant 0 : index
    %c0_0 = arith.constant 0 : index
    %c0_1 = arith.constant 0 : index
    %0 = vector.load %arg1[%c0, %c0_0, %c0_1] : memref<2x10x128xf32, #tpu.memory_space<vmem>>, vector<2x10x128xf32>
    %cst = arith.constant dense<0.000000e+00> : vector<2x128xf32>
    %1 = vector.multi_reduction <add>, %0, %cst [1] : vector<2x10x128xf32> to vector<2x128xf32>
    %c0_2 = arith.constant 0 : index
    %c0_3 = arith.constant 0 : index
    %2 = vector.load %arg2[%c0_2, %c0_3] : memref<128x32xf32, #tpu.memory_space<vmem>>, vector<128x32xf32>
    %cst_4 = arith.constant dense<0.000000e+00> : vector<2x32xf32>
    %3 = tpu.matmul %1, %2, %cst_4 {dimension_numbers = #tpu.dot_dimension_numbers<[1], [0], [0], [1], [0, 0, 1, 1], [], []>} : vector<2x128xf32>, vector<128x32xf32>, vector<2x32xf32> -> vector<2x32xf32>
    %c0_5 = arith.constant 0 : index
    %c0_6 = arith.constant 0 : index
    %4 = vector.load %arg3[%c0_5, %c0_6] : memref<1x32xf32, #tpu.memory_space<vmem>>, vector<1x32xf32>
    %5 = vector.broadcast %4 : vector<1x32xf32> to vector<2x32xf32>
    %6 = arith.addf %3, %5 : vector<2x32xf32>
    %cst_7 = arith.constant 5.000000e-01 : f32
    %7 = vector.broadcast %cst_7 : f32 to vector<2x32xf32>
    %8 = arith.mulf %7, %6 : vector<2x32xf32>
    %cst_8 = arith.constant 0.707106769 : f32
    %9 = vector.broadcast %cst_8 : f32 to vector<2x32xf32>
    %10 = arith.mulf %6, %9 : vector<2x32xf32>
    %11 = math.erf %10 : vector<2x32xf32>
    %cst_9 = arith.constant 1.000000e+00 : f32
    %12 = vector.broadcast %cst_9 : f32 to vector<2x32xf32>
    %13 = arith.addf %12, %11 : vector<2x32xf32>
    %14 = arith.mulf %8, %13 : vector<2x32xf32>
    %c0_10 = arith.constant 0 : index
    %c0_11 = arith.constant 0 : index
    %15 = vector.load %arg4[%c0_10, %c0_11] : memref<32x128xf32, #tpu.memory_space<vmem>>, vector<32x128xf32>
    %cst_12 = arith.constant dense<0.000000e+00> : vector<2x128xf32>
    %16 = tpu.matmul %14, %15, %cst_12 {dimension_numbers = #tpu.dot_dimension_numbers<[1], [0], [0], [1], [0, 0, 1, 1], [], []>} : vector<2x32xf32>, vector<32x128xf32>, vector<2x128xf32> -> vector<2x128xf32>
    %c0_13 = arith.constant 0 : index
    %c0_14 = arith.constant 0 : index
    %17 = vector.load %arg5[%c0_13, %c0_14] : memref<1x128xf32, #tpu.memory_space<vmem>>, vector<1x128xf32>
    %18 = vector.broadcast %17 : vector<1x128xf32> to vector<2x128xf32>
    %19 = arith.addf %16, %18 : vector<2x128xf32>
    %c0_15 = arith.constant 0 : index
    %c0_16 = arith.constant 0 : index
    %20 = vector.load %arg6[%c0_15, %c0_16] : memref<2x128xf32, #tpu.memory_space<vmem>>, vector<2x128xf32>
    tpu.vector_store %arg6[%c0_15, %c0_16], %19 {strides = array<i32>} : memref<2x128xf32, #tpu.memory_space<vmem>>, vector<2x128xf32>,
    return
  }
  func.func @transform_0(%arg0: i32) -> (i32, i32, i32) {
    %c0_i32 = arith.constant 0 : i32
    %c0_i32_0 = arith.constant 0 : i32
    %c0_i32_1 = arith.constant 0 : i32
    return %arg0, %c0_i32, %c0_i32_0 : i32, i32, i32
  }
  func.func @transform_1(%arg0: i32) -> (i32, i32) {
    %c0_i32 = arith.constant 0 : i32
    %c0_i32_0 = arith.constant 0 : i32
    %c0_i32_1 = arith.constant 0 : i32
    return %c0_i32, %c0_i32_0 : i32, i32
  }
  func.func @transform_2(%arg0: i32) -> (i32, i32) {
    %c0_i32 = arith.constant 0 : i32
    %c0_i32_0 = arith.constant 0 : i32
    %c0_i32_1 = arith.constant 0 : i32
    return %c0_i32, %c0_i32_0 : i32, i32
  }
  func.func @transform_3(%arg0: i32) -> (i32, i32) {
    %c0_i32 = arith.constant 0 : i32
    %c0_i32_0 = arith.constant 0 : i32
    %c0_i32_1 = arith.constant 0 : i32
    return %c0_i32, %c0_i32_0 : i32, i32
  }
  func.func @transform_4(%arg0: i32) -> (i32, i32) {
    %c0_i32 = arith.constant 0 : i32
    %c0_i32_0 = arith.constant 0 : i32
    %c0_i32_1 = arith.constant 0 : i32
    return %c0_i32, %c0_i32_0 : i32, i32
  }
  func.func @transform_5(%arg0: i32) -> (i32, i32) {
    %c0_i32 = arith.constant 0 : i32
    %c0_i32_0 = arith.constant 0 : i32
    return %arg0, %c0_i32 : i32, i32
  }
}

</mosaic_0001>

<bundles_post_ra>
// kernel: bert_cls_head.1
= control target key start
LH: loop header
LB: loop body
LE: loop exit
PB: predicated region body
PF: predicated region fallthrough
CT: control target
= control target key end

     0   :  { %v376_v3 = vmov 0.0|0.0   ;;  %vm377_vm0 = vmmov 0   ;;  %v378_v6 = vmov 0.0   ;;  %vm25_vm1 = vcmask 1041408   ;;  %s510_s0 = inlined_call_operand.vmem [shape: f32[2,10,128], index: 0, kind: input, shape index: {}]   ;;  %s511_s1 = inlined_call_operand.vmem [shape: f32[128,32], index: 1, kind: input, shape index: {}]   ;;  %s512_s2 = inlined_call_operand.vmem [shape: f32[1,32], index: 2, kind: input, shape index: {}]   ;;  %s513_s3 = inlined_call_operand.vmem [shape: f32[32,128], index: 3, kind: input, shape index: {}]   ;;  %s514_s4 = inlined_call_operand.vmem [shape: f32[1,128], index: 4, kind: input, shape index: {}]   ;;  %s515_s5 = inlined_call_operand.hbm [shape: f32[2,128], index: 5, kind: output, shape index: {}]  }
   0x1   :  { %v42_v0 = vld [vmem:[%s511_s1] sm:$0xff]  ;;  %v43_v1 = vld [vmem:[%s511_s1 + $0x8] sm:$0xff]  ;;  %v44_v2 = vld [vmem:[%s511_s1 + $0x10] sm:$0xff]  ;;  %316 = vmatprep.subr.bf16.mxu0 %v376_v3  ;;  %302 = vmatprep.mubr.msk.f32.mxu0 %vm377_vm0, %v378_v6 }
   0x2   :  { %v317_v4 = vpack.c.bf16 %v43_v1, %v42_v0  ;;  %v45_v5 = vld [vmem:[%s511_s1 + $0x18] sm:$0xff]  ;;  %340 = vmatprep.subr.bf16.mxu1 %v376_v3  ;;  %313 = vmatprep.mubr.msk.f32.mxu1 %vm377_vm0, %v378_v6  ;;  %v46_v8 = vld [vmem:[%s511_s1 + $0x20] sm:$0xff]  ;;  %v47_v9 = vld [vmem:[%s511_s1 + $0x28] sm:$0xff] }
   0x3   :  { %v320_v7 = vpack.c.bf16 %v45_v5, %v44_v2  ;;  %v21_v10 = vld [vmem:[%s510_s0] sm:$0xff]  ;;  %v22_v11 = vld [vmem:[%s510_s0 + $0x8] sm:$0x3]  ;;  %v23_v12 = vld [vmem:[%s510_s0 + $0x10] sm:$0xff]  ;;  %v323_v15 = vpack.c.bf16 %v47_v9, %v46_v8 }
   0x4   :  { %318 = vmatpush3.bf16.msra.mxu0 %v317_v4  ;;  %v24_v13 = vld [vmem:[%s510_s0 + $0x18] sm:$0x3]  ;;  %v26_v14 = vsel %vm25_vm1, %v22_v11, 0.0 }
   0x5   :  { %319 = vmatprep.subr.bf16.mxu0 %v376_v3  ;;  %v27_v16 = vadd.f32 %v26_v14, %v21_v10  ;;  %v34_v17 = vsel %vm25_vm1, %v24_v13, 0.0 }
   0x8   :  { %321 = vmatpush3.bf16.msra.mxu0 %v320_v7 }
   0x9   :  { %10 = vsyncpa [#allocation3], 0  ;;  %322 = vmatprep.subr.bf16.mxu0 %v376_v3  ;;  %v48_v18 = vld [vmem:[%s511_s1 + $0x30] sm:$0xff]  ;;  %v49_v19 = vld [vmem:[%s511_s1 + $0x38] sm:$0xff]  ;;  %v35_v20 = vadd.f32 %v34_v17, %v23_v12  ;;  %v28_v21 = vrot.slane %v27_v16, 4  ;;  %vm67_vm2 = vcmask 1041409  }
   0xa   :  { %v326_v23 = vpack.c.bf16 %v49_v19, %v48_v18  ;;  %v50_v25 = vld [vmem:[%s511_s1 + $0x40] sm:$0xff]  ;;  %v51_v26 = vld [vmem:[%s511_s1 + $0x48] sm:$0xff]  ;;  %v52_v31 = vld [vmem:[%s511_s1 + $0x50] sm:$0xff]  ;;  %vm156_vm3 = vcmask 261120  }
   0xb   :  { %v36_v22 = vrot.slane %v35_v20, 4  ;;  %v29_v24 = vadd.f32 %v28_v21, %v27_v16  ;;  %v329_v28 = vpack.c.bf16 %v51_v26, %v50_v25  ;;  %v53_v32 = vld [vmem:[%s511_s1 + $0x58] sm:$0xff]  ;;  %v54_v36 = vld [vmem:[%s511_s1 + $0x60] sm:$0xff]  ;;  %v55_v37 = vld [vmem:[%s511_s1 + $0x68] sm:$0xff] }
   0xc   :  { %324 = vmatpush3.bf16.msra.mxu0 %v323_v15  ;;  %v332_v33 = vpack.c.bf16 %v53_v32, %v52_v31  ;;  %v335_v38 = vpack.c.bf16 %v55_v37, %v54_v36  ;;  %v56_v41 = vld [vmem:[%s511_s1 + $0x70] sm:$0xff]  ;;  %v57_v42 = vld [vmem:[%s511_s1 + $0x78] sm:$0xff]  ;;  %v145_v47 = vld [vmem:[%s513_s3] sm:$0xff] }
   0xd   :  { %325 = vmatprep.subr.bf16.mxu0 %v376_v3  ;;  %v37_v27 = vadd.f32 %v36_v22, %v35_v20  ;;  %v30_v29 = vrot.slane %v29_v24, 2  ;;  %v338_v43 = vpack.c.bf16 %v57_v42, %v56_v41  ;;  %v146_v48 = vld [vmem:[%s513_s3 + $0x8] sm:$0xff]  ;;  %v147_v50 = vld [vmem:[%s513_s3 + $0x10] sm:$0xff]  ;;  %v148_v51 = vld [vmem:[%s513_s3 + $0x18] sm:$0xff]  ;;  %s379_s3 = smov [#allocation2]  }
   0xe   :  { %v341_v49 = vpack.c.bf16 %v146_v48, %v145_v47  ;;  %v344_v52 = vpack.c.bf16 %v148_v51, %v147_v50  ;;  %v245_v53 = vld [vmem:[%s512_s2] ss:$0 sm:$0xff]  ;;  %s237_s17 = sshll.u32 %s379_s3, 4  ;;  %s238_s17 = int_to_ptr.vmem [resolvable:$true] %s237_s17 }
   0xf   :  { %v38_v30 = vrot.slane %v37_v27, 2  ;;  %v31_v34 = vadd.f32 %v30_v29, %v29_v24  ;;  %v246_v62 = vld [vmem:[%s514_s4] ss:$0 sm:$0xff]  ;;  %s352_s2 = scalar_lea.vmem %s238_s17, 32  ;;  %p357_p1 = scmp.lt.s32.totalorder %s238_s17, %s238_s17 }
  0x10   :  { %327 = vmatpush3.bf16.msra.mxu0 %v326_v23  ;;  %342 = vmatpush3.bf16.msra.mxu1 %v341_v49  ;;  %p353_p0 = scmp.ne.s32.totalorder %s238_s17, %s352_s2  ;;  %p358_p2 = scmp.lt.s32.totalorder %s352_s2, %s352_s2 }
  0x11   :  { %328 = vmatprep.subr.bf16.mxu0 %v376_v3  ;;  %v39_v35 = vadd.f32 %v38_v30, %v37_v27  ;;  %v32_v39 = vrot.slane %v31_v34, 1  ;;  %343 = vmatprep.subr.bf16.mxu1 %v376_v3 }
  0x12   :  { %p359_p3 = por %p358_p2, %p357_p1 }
  0x13   :  { %v40_v40 = vrot.slane %v39_v35, 1  ;;  %v33_v44 = vadd.f32 %v32_v39, %v31_v34 }
  0x14   :  { %330 = vmatpush3.bf16.msra.mxu0 %v329_v28  ;;  %345 = vmatpush3.bf16.msra.mxu1 %v344_v52  ;;  %p360_p4 = pnand %p359_p3, %p353_p0 }
  0x15   :  { %331 = vmatprep.subr.bf16.mxu0 %v376_v3  ;;  %v41_v45 = vadd.f32 %v40_v40, %v39_v35 }
  0x17   :  { %v68_v46 = vsel %vm67_vm2, %v41_v45, %v33_v44 }
  0x18   :  { %333 = vmatpush3.bf16.msra.mxu0 %v332_v33 }
  0x19   :  { %334 = vmatprep.subr.bf16.mxu0 %v376_v3 }
  0x1c   :  { %336 = vmatpush3.bf16.msra.mxu0 %v335_v38 }
  0x1d   :  { %337 = vmatprep.subr.bf16.mxu0 %v376_v3 }
  0x20   :  { %339 = vmatpush3.bf16.msra.mxu0 %v338_v43 }
  0x23   :  { %303 = vmatmul.mubr.f32.vlgmr.msra.gmra.mrb[0].mxu0 %v68_v46 }
  0xf6   :  { %v136_v54 = vpop.f32.mrb[0].mxu0 }
  0xf7   :  { %v137_v55 = vadd.f32 %v245_v53, %v136_v54  ;;  %v304_v56 = vpop.f32.mrb[1].mxu0 }
  0xf9   :  { %v141_v57 = vmul.f32 0.70710677, %v137_v55  ;;  %v140_v59 = vmul.f32 0.5, %v137_v55 }
  0xfb   :  { %350 = verf.f32 %v141_v57 }
 0x105   :  { %v351_v58 = vpop.eup %350 }
 0x106   :  { %v143_v60 = vadd.f32 1.0, %v351_v58 }
 0x108   :  { %v144_v61 = vmul.f32 %v143_v60, %v140_v59 }
 0x10a   :  { %314 = vmatmul.mubr.msk.f32.vlgmr.msra.gmra.mrb[0].mxu1 %vm156_vm3, %v144_v61 }
 0x1dd   :  { %v226_v63 = vpop.f32.mrb[0].mxu1 }
 0x1de   :  { %v227_v0 = vadd.f32 %v246_v62, %v226_v63  ;;  %v315_v1 = vpop.f32.mrb[1].mxu1 }
 0x1e0   :  { %230 = vst [vmem:[#allocation2] sm:$0x3] %v227_v0 }
 0x1e1   :  { %363 = shalt.err (!%p360_p4)
}
 0x1e2   :  { %s364_s20 = scalar_lea.hbm %s515_s5, 32 }
 0x1e3   :  { %p365_p5 = scmp.ne.s32.totalorder %s515_s5, %s364_s20  ;;  %p368_p6 = scmp.lt.u32.totalorder %s364_s20, %s515_s5 }
 0x1e5   :  { %p370_p7 = pnand %p368_p6, %p365_p5 }
 0x1e7   :  { %373 = shalt.err (!%p370_p7)
}
 0x1e8   :  { %240 = dma.vmem_to_hbm [thread:$0]  %s238_s17, 32, %s515_s5, [#allocation3]  }
 0x1e9   :  { %374 = dma.done.wait [#allocation3], 32  }
 0x1ea   :  { %375 = vsyncadd [#allocation3], 4294967264 }
 0x1eb   :  { %244 = vsyncpa [#allocation3], 1 }

</bundles_post_ra>
